<compile_context>
chip_gen: v7x
topology: tpu7x:2x2x1
jax: 0.10.0
libtpu: 0.0.40
codegen_flags: <defaults>
</compile_context>

<pallas_src>
import functools

import jax
import jax.numpy as jnp
from jax.experimental import pallas as pl
from jax.experimental.pallas import tpu as pltpu


def _round_up(v, m):
    return (v + m - 1) // m * m


def _fused_gcn_kernel(x_ref, w1_ref, b1_ref, w2_ref, b2_ref, adj_ref, out_ref,
                      s1_ref, adjs_ref, h_ref, *, tm, nclass):
    i = pl.program_id(0)
    nt = pl.num_programs(0)

    # support1 = X @ W1 computed once; stays resident in VMEM for every tile.
    @pl.when(i == 0)
    def _():
        s1 = jnp.dot(x_ref[...], w1_ref[...], preferred_element_type=jnp.float32)
        s1_ref[...] = s1.astype(s1_ref.dtype)

    row0 = pl.multiple_of(i * tm, tm)

    # Stash this streamed adj row tile so layer 2 can reuse it from VMEM
    # (adjacency is only read from HBM once).
    adjs_ref[pl.ds(row0, tm), :] = adj_ref[...]

    # Layer 1 for this row tile: h = relu(adj_tile @ support1 + b1)
    h_tile = jnp.dot(adj_ref[...], s1_ref[...], preferred_element_type=jnp.float32)
    h_tile = jnp.maximum(h_tile + b1_ref[...], 0.0)
    h_ref[pl.ds(row0, tm), :] = h_tile.astype(h_ref.dtype)

    # Finalize at the last tile: layer 2 + log_softmax entirely from VMEM,
    # single lane-dense write of the output block.
    @pl.when(i == nt - 1)
    def _():
        s2 = jnp.dot(h_ref[...], w2_ref[...], preferred_element_type=jnp.float32)
        z = jnp.dot(adjs_ref[...], s2.astype(adjs_ref.dtype),
                    preferred_element_type=jnp.float32)
        z = z + b2_ref[...]
        # Mask padded class columns out of the softmax.
        col = jax.lax.broadcasted_iota(jnp.int32, z.shape, 1)
        z = jnp.where(col < nclass, z, -1e30)
        m = jnp.max(z, axis=1, keepdims=True)
        lse = m + jnp.log(jnp.sum(jnp.exp(z - m), axis=1, keepdims=True))
        out_ref[...] = (z - lse).astype(out_ref.dtype)


def gcn_forward(x, adj, params, dropout_p=0.5, training=False, *, tm=256):
    """Forward pass of the 2-layer GCN. x: [N, F] f32, adj: [N, N] f32 (normalized)."""
    w1, b1, w2, b2 = params
    N, F = x.shape
    nhid = w1.shape[1]
    nclass = w2.shape[1]

    f32, bf16 = jnp.float32, jnp.bfloat16

    # Lane padding for hidden / class dims; row-tile size for the adjacency stream.
    H_pad = _round_up(nhid, 128)
    C_pad = _round_up(nclass, 128)
    tm = _round_up(max(16, tm), 16)          # multiple of 16: safe bf16 sublane packing
    tm = min(tm, _round_up(N, 16))
    N_pad = _round_up(N, tm)
    num_tiles = N_pad // tm

    # Zero-pad operands; cast MXU inputs to bf16 (f32 accumulation inside kernel).
    adj_p = jnp.zeros((N_pad, N_pad), bf16).at[:N, :N].set(adj.astype(bf16))
    x_p = jnp.zeros((N_pad, F), bf16).at[:N, :].set(x.astype(bf16))
    w1_p = jnp.zeros((F, H_pad), bf16).at[:, :nhid].set(w1.astype(bf16))
    b1_p = jnp.zeros((1, H_pad), f32).at[0, :nhid].set(b1.astype(f32))
    w2_p = jnp.zeros((H_pad, C_pad), bf16).at[:nhid, :nclass].set(w2.astype(bf16))
    b2_p = jnp.zeros((1, C_pad), f32).at[0, :nclass].set(b2.astype(f32))

    if training:
        pass  # TODO(synk): training-mode dropout not implemented (eval-mode is identity)

    # VMEM budget estimate (double-buffered adj tiles + resident operands + scratch).
    est = (2 * tm * N_pad * 2            # streamed adj tiles (bf16, 2 buffers)
           + N_pad * N_pad * 2           # adj VMEM copy (scratch)
           + N_pad * F * 2               # resident x
           + F * H_pad * 2 + H_pad * C_pad * 2
           + (H_pad + C_pad) * 4
           + 2 * N_pad * H_pad * 2       # support1 + h scratch
           + N_pad * C_pad * 4)          # resident output block
    vmem_limit = int(min(64 * 1024 * 1024, max(2 * est, 16 * 1024 * 1024)))

    flops = int(2 * N_pad * F * H_pad + 2 * N_pad * N_pad * H_pad
                + 2 * N_pad * H_pad * C_pad + 2 * N_pad * N_pad * C_pad)
    transcendentals = int(N_pad * C_pad + N_pad)
    bytes_accessed = int(N_pad * N_pad * 2 + N_pad * F * 2
                         + F * H_pad * 2 + H_pad * C_pad * 2
                         + (H_pad + C_pad) * 4 + N_pad * C_pad * 4)

    kernel = functools.partial(_fused_gcn_kernel, tm=tm, nclass=nclass)
    out_p = pl.pallas_call(
        kernel,
        out_shape=jax.ShapeDtypeStruct((N_pad, C_pad), f32),
        grid=(num_tiles,),
        in_specs=[
            pl.BlockSpec((N_pad, F), lambda i: (0, 0)),       # x      (resident)
            pl.BlockSpec((F, H_pad), lambda i: (0, 0)),       # W1     (resident)
            pl.BlockSpec((1, H_pad), lambda i: (0, 0)),       # b1     (resident)
            pl.BlockSpec((H_pad, C_pad), lambda i: (0, 0)),   # W2     (resident)
            pl.BlockSpec((1, C_pad), lambda i: (0, 0)),       # b2     (resident)
            pl.BlockSpec((tm, N_pad), lambda i: (i, 0)),      # adj    (streamed tiles)
        ],
        out_specs=pl.BlockSpec((N_pad, C_pad), lambda i: (0, 0)),  # resident output
        scratch_shapes=[
            pltpu.VMEM((N_pad, H_pad), bf16),   # support1 = x @ W1
            pltpu.VMEM((N_pad, N_pad), bf16),   # adj copy reused by layer 2
            pltpu.VMEM((N_pad, H_pad), bf16),   # h = relu(adj @ support1 + b1)
        ],
        compiler_params=pltpu.CompilerParams(
            dimension_semantics=("arbitrary",),   # grid axis carries state -> sequential
            vmem_limit_bytes=vmem_limit,
        ),
        cost_estimate=pl.CostEstimate(
            flops=flops, transcendentals=transcendentals, bytes_accessed=bytes_accessed),
    )(x_p, w1_p, b1_p, w2_p, b2_p, adj_p)

    return out_p[:N, :nclass]


def init_params(key, nfeat, nhid, nclass):
    # Mirrors GraphConvolution.reset_parameters: U(-stdv, stdv), stdv = 1/sqrt(out_dim)
    k1, k2, k3, k4 = jax.random.split(key, 4)
    s1 = 1.0 / jnp.sqrt(nhid)
    s2 = 1.0 / jnp.sqrt(nclass)
    w1 = jax.random.uniform(k1, (nfeat, nhid), jnp.float32, -s1, s1)
    b1 = jax.random.uniform(k2, (nhid,), jnp.float32, -s1, s1)
    w2 = jax.random.uniform(k3, (nhid, nclass), jnp.float32, -s2, s2)
    b2 = jax.random.uniform(k4, (nclass,), jnp.float32, -s2, s2)
    return w1, b1, w2, b2


if __name__ == "__main__":
    N, nfeat, nhid, nclass = 64, 32, 16, 8
    key = jax.random.PRNGKey(0)
    kx, ka, kp = jax.random.split(key, 3)

    # node features
    x = jax.random.normal(kx, (N, nfeat), jnp.float32)

    # dense symmetric-ish adjacency with self loops, row-normalized
    a = (jax.random.uniform(ka, (N, N)) < 0.1).astype(jnp.float32)
    a = jnp.maximum(a, a.T) + jnp.eye(N, dtype=jnp.float32)
    adj = a / jnp.sum(a, axis=1, keepdims=True)

    params = init_params(kp, nfeat, nhid, nclass)

    # tm=16 -> 4 adjacency row tiles, exercising the pipelined multi-tile path.
    out = gcn_forward(x, adj, params, dropout_p=0.5, training=False, tm=16)
    out = jax.block_until_ready(out)

    assert out.shape == (N, nclass)
    # rows of log_softmax should exp-sum to 1
    assert bool(jnp.allclose(jnp.sum(jnp.exp(out), axis=1), 1.0, atol=1e-3))
    print("KERNEL_OK")
</pallas_src>

<mosaic_0001>
module attributes {stable_mosaic.version = 11 : i64} {
  func.func @_fused_gcn_kernel(%arg0: i32, %arg1: memref<64x32xbf16, #tpu.memory_space<vmem>>, %arg2: memref<32x128xbf16, #tpu.memory_space<vmem>>, %arg3: memref<1x128xf32, #tpu.memory_space<vmem>>, %arg4: memref<128x128xbf16, #tpu.memory_space<vmem>>, %arg5: memref<1x128xf32, #tpu.memory_space<vmem>>, %arg6: memref<16x64xbf16, #tpu.memory_space<vmem>>, %arg7: memref<64x128xf32, #tpu.memory_space<vmem>>, %arg8: memref<64x128xbf16, #tpu.memory_space<vmem>>, %arg9: memref<64x64xbf16, #tpu.memory_space<vmem>>, %arg10: memref<64x128xbf16, #tpu.memory_space<vmem>>) attributes {dimension_semantics = [#tpu.dimension_semantics<arbitrary>], iteration_bounds = array<i64: 4>, scalar_prefetch = 0 : i64, scratch_operands = 3 : i64, tpu.core_type = #tpu.core_type<tc>, window_params = [{pipeline_mode = #tpu.pipeline_mode<synchronous>, transform_indices = @transform_0, window_bounds = array<i64: 64, 32>}, {pipeline_mode = #tpu.pipeline_mode<synchronous>, transform_indices = @transform_1, window_bounds = array<i64: 32, 128>}, {pipeline_mode = #tpu.pipeline_mode<synchronous>, transform_indices = @transform_2, window_bounds = array<i64: 1, 128>}, {pipeline_mode = #tpu.pipeline_mode<synchronous>, transform_indices = @transform_3, window_bounds = array<i64: 128, 128>}, {pipeline_mode = #tpu.pipeline_mode<synchronous>, transform_indices = @transform_4, window_bounds = array<i64: 1, 128>}, {transform_indices = @transform_5, window_bounds = array<i64: 16, 64>}, {pipeline_mode = #tpu.pipeline_mode<synchronous>, transform_indices = @transform_6, window_bounds = array<i64: 64, 128>}]} {
    %c0_i32 = arith.constant 0 : i32
    %0 = arith.cmpi eq, %arg0, %c0_i32 : i32
    %1 = arith.extui %0 : i1 to i32
    %c0_i32_0 = arith.constant 0 : i32
    %2 = arith.cmpi ne, %1, %c0_i32_0 : i32
    scf.if %2 {
      %c0_12 = arith.constant 0 : index
      %c0_13 = arith.constant 0 : index
      %22 = vector.load %arg1[%c0_12, %c0_13] : memref<64x32xbf16, #tpu.memory_space<vmem>>, vector<64x32xbf16>
      %c0_14 = arith.constant 0 : index
      %c0_15 = arith.constant 0 : index
      %23 = vector.load %arg2[%c0_14, %c0_15] : memref<32x128xbf16, #tpu.memory_space<vmem>>, vector<32x128xbf16>
      %cst_16 = arith.constant dense<0.000000e+00> : vector<64x128xf32>
      %24 = tpu.matmul %22, %23, %cst_16 {dimension_numbers = #tpu.dot_dimension_numbers<[1], [0], [0], [1], [0, 0, 1, 1], [], []>} : vector<64x32xbf16>, vector<32x128xbf16>, vector<64x128xf32> -> vector<64x128xf32>
      %25 = arith.truncf %24 : vector<64x128xf32> to vector<64x128xbf16>
      %c0_17 = arith.constant 0 : index
      %c0_18 = arith.constant 0 : index
      %26 = vector.load %arg8[%c0_17, %c0_18] : memref<64x128xbf16, #tpu.memory_space<vmem>>, vector<64x128xbf16>
      tpu.vector_store %arg8[%c0_17, %c0_18], %25 {strides = array<i32>} : memref<64x128xbf16, #tpu.memory_space<vmem>>, vector<64x128xbf16>,
    } else {
    }
    %c16_i32 = arith.constant 16 : i32
    %3 = arith.muli %arg0, %c16_i32 : i32
    %4 = tpu.assume_multiple %3, 16 : i32
    %c0 = arith.constant 0 : index
    %c0_1 = arith.constant 0 : index
    %5 = vector.load %arg6[%c0, %c0_1] : memref<16x64xbf16, #tpu.memory_space<vmem>>, vector<16x64xbf16>
    %6 = arith.index_cast %4 : i32 to index
    %c0_2 = arith.constant 0 : index
    %7 = vector.load %arg9[%6, %c0_2] : memref<64x64xbf16, #tpu.memory_space<vmem>>, vector<16x64xbf16>
    tpu.vector_store %arg9[%6, %c0_2], %5 {strides = array<i32>} : memref<64x64xbf16, #tpu.memory_space<vmem>>, vector<16x64xbf16>,
    %c0_3 = arith.constant 0 : index
    %c0_4 = arith.constant 0 : index
    %8 = vector.load %arg6[%c0_3, %c0_4] : memref<16x64xbf16, #tpu.memory_space<vmem>>, vector<16x64xbf16>
    %c0_5 = arith.constant 0 : index
    %c0_6 = arith.constant 0 : index
    %9 = vector.load %arg8[%c0_5, %c0_6] : memref<64x128xbf16, #tpu.memory_space<vmem>>, vector<64x128xbf16>
    %cst = arith.constant dense<0.000000e+00> : vector<16x128xf32>
    %10 = tpu.matmul %8, %9, %cst {dimension_numbers = #tpu.dot_dimension_numbers<[1], [0], [0], [1], [0, 0, 1, 1], [], []>} : vector<16x64xbf16>, vector<64x128xbf16>, vector<16x128xf32> -> vector<16x128xf32>
    %c0_7 = arith.constant 0 : index
    %c0_8 = arith.constant 0 : index
    %11 = vector.load %arg3[%c0_7, %c0_8] : memref<1x128xf32, #tpu.memory_space<vmem>>, vector<1x128xf32>
    %12 = vector.broadcast %11 : vector<1x128xf32> to vector<16x128xf32>
    %13 = arith.addf %10, %12 : vector<16x128xf32>
    %cst_9 = arith.constant 0.000000e+00 : f32
    %14 = vector.broadcast %cst_9 : f32 to vector<16x128xf32>
    %15 = arith.maximumf %13, %14 : vector<16x128xf32>
    %16 = arith.truncf %15 : vector<16x128xf32> to vector<16x128xbf16>
    %17 = arith.index_cast %4 : i32 to index
    %c0_10 = arith.constant 0 : index
    %18 = vector.load %arg10[%17, %c0_10] : memref<64x128xbf16, #tpu.memory_space<vmem>>, vector<16x128xbf16>
    tpu.vector_store %arg10[%17, %c0_10], %16 {strides = array<i32>} : memref<64x128xbf16, #tpu.memory_space<vmem>>, vector<16x128xbf16>,
    %c3_i32 = arith.constant 3 : i32
    %19 = arith.cmpi eq, %arg0, %c3_i32 : i32
    %20 = arith.extui %19 : i1 to i32
    %c0_i32_11 = arith.constant 0 : i32
    %21 = arith.cmpi ne, %20, %c0_i32_11 : i32
    scf.if %21 {
      %c0_12 = arith.constant 0 : index
      %c0_13 = arith.constant 0 : index
      %22 = vector.load %arg10[%c0_12, %c0_13] : memref<64x128xbf16, #tpu.memory_space<vmem>>, vector<64x128xbf16>
      %c0_14 = arith.constant 0 : index
      %c0_15 = arith.constant 0 : index
      %23 = vector.load %arg4[%c0_14, %c0_15] : memref<128x128xbf16, #tpu.memory_space<vmem>>, vector<128x128xbf16>
      %cst_16 = arith.constant dense<0.000000e+00> : vector<64x128xf32>
      %24 = tpu.matmul %22, %23, %cst_16 {dimension_numbers = #tpu.dot_dimension_numbers<[1], [0], [0], [1], [0, 0, 1, 1], [], []>} : vector<64x128xbf16>, vector<128x128xbf16>, vector<64x128xf32> -> vector<64x128xf32>
      %c0_17 = arith.constant 0 : index
      %c0_18 = arith.constant 0 : index
      %25 = vector.load %arg9[%c0_17, %c0_18] : memref<64x64xbf16, #tpu.memory_space<vmem>>, vector<64x64xbf16>
      %26 = arith.truncf %24 : vector<64x128xf32> to vector<64x128xbf16>
      %cst_19 = arith.constant dense<0.000000e+00> : vector<64x128xf32>
      %27 = tpu.matmul %25, %26, %cst_19 {dimension_numbers = #tpu.dot_dimension_numbers<[1], [0], [0], [1], [0, 0, 1, 1], [], []>} : vector<64x64xbf16>, vector<64x128xbf16>, vector<64x128xf32> -> vector<64x128xf32>
      %c0_20 = arith.constant 0 : index
      %c0_21 = arith.constant 0 : index
      %28 = vector.load %arg5[%c0_20, %c0_21] : memref<1x128xf32, #tpu.memory_space<vmem>>, vector<1x128xf32>
      %29 = vector.broadcast %28 : vector<1x128xf32> to vector<64x128xf32>
      %30 = arith.addf %27, %29 : vector<64x128xf32>
      %31 = tpu.iota {dimensions = array<i32: 1>} : vector<64x128xi32>
      %c8_i32 = arith.constant 8 : i32
      %32 = vector.broadcast %c8_i32 : i32 to vector<64x128xi32>
      %33 = arith.cmpi slt, %31, %32 : vector<64x128xi32>
      %cst_22 = arith.constant -1.000000e+30 : f32
      %34 = vector.broadcast %cst_22 : f32 to vector<64x128xf32>
      %35 = arith.select %33, %30, %34 : vector<64x128xi1>, vector<64x128xf32>
      %cst_23 = arith.constant dense<0xFF800000> : vector<64xf32>
      %36 = vector.multi_reduction <maximumf>, %35, %cst_23 [1] : vector<64x128xf32> to vector<64xf32>
      %37 = vector.shape_cast %36 : vector<64xf32> to vector<64x1xf32>
      %38 = vector.broadcast %37 : vector<64x1xf32> to vector<64x128xf32>
      %39 = arith.subf %35, %38 : vector<64x128xf32>
      %40 = math.exp %39 : vector<64x128xf32>
      %cst_24 = arith.constant dense<0.000000e+00> : vector<64xf32>
      %41 = vector.multi_reduction <add>, %40, %cst_24 [1] : vector<64x128xf32> to vector<64xf32>
      %42 = vector.shape_cast %41 : vector<64xf32> to vector<64x1xf32>
      %43 = math.log %42 : vector<64x1xf32>
      %44 = arith.addf %37, %43 : vector<64x1xf32>
      %45 = vector.broadcast %44 : vector<64x1xf32> to vector<64x128xf32>
      %46 = arith.subf %35, %45 : vector<64x128xf32>
      %c0_25 = arith.constant 0 : index
      %c0_26 = arith.constant 0 : index
      %47 = vector.load %arg7[%c0_25, %c0_26] : memref<64x128xf32, #tpu.memory_space<vmem>>, vector<64x128xf32>
      tpu.vector_store %arg7[%c0_25, %c0_26], %46 {strides = array<i32>} : memref<64x128xf32, #tpu.memory_space<vmem>>, vector<64x128xf32>,
    } else {
    }
    return
  }
  func.func @transform_0(%arg0: i32) -> (i32, i32) {
    %c0_i32 = arith.constant 0 : i32
    %c0_i32_0 = arith.constant 0 : i32
    %c0_i32_1 = arith.constant 0 : i32
    return %c0_i32, %c0_i32_0 : i32, i32
  }
  func.func @transform_1(%arg0: i32) -> (i32, i32) {
    %c0_i32 = arith.constant 0 : i32
    %c0_i32_0 = arith.constant 0 : i32
    %c0_i32_1 = arith.constant 0 : i32
    return %c0_i32, %c0_i32_0 : i32, i32
  }
  func.func @transform_2(%arg0: i32) -> (i32, i32) {
    %c0_i32 = arith.constant 0 : i32
    %c0_i32_0 = arith.constant 0 : i32
    %c0_i32_1 = arith.constant 0 : i32
    return %c0_i32, %c0_i32_0 : i32, i32
  }
  func.func @transform_3(%arg0: i32) -> (i32, i32) {
    %c0_i32 = arith.constant 0 : i32
    %c0_i32_0 = arith.constant 0 : i32
    %c0_i32_1 = arith.constant 0 : i32
    return %c0_i32, %c0_i32_0 : i32, i32
  }
  func.func @transform_4(%arg0: i32) -> (i32, i32) {
    %c0_i32 = arith.constant 0 : i32
    %c0_i32_0 = arith.constant 0 : i32
    %c0_i32_1 = arith.constant 0 : i32
    return %c0_i32, %c0_i32_0 : i32, i32
  }
  func.func @transform_5(%arg0: i32) -> (i32, i32) {
    %c0_i32 = arith.constant 0 : i32
    %c0_i32_0 = arith.constant 0 : i32
    return %arg0, %c0_i32 : i32, i32
  }
  func.func @transform_6(%arg0: i32) -> (i32, i32) {
    %c0_i32 = arith.constant 0 : i32
    %c0_i32_0 = arith.constant 0 : i32
    %c0_i32_1 = arith.constant 0 : i32
    return %c0_i32, %c0_i32_0 : i32, i32
  }
}

</mosaic_0001>

<bundles_post_ra>
// kernel: tpu_custom_call.1
= control target key start
LH: loop header
LB: loop body
LE: loop exit
PB: predicated region body
PF: predicated region fallthrough
CT: control target
= control target key end

     0   :  { %11 = vsyncpa [#allocation6], 0  ;;  %s1403_s0 = inlined_call_operand.vmem [shape: bf16[64,32], index: 0, kind: input, shape index: {}]   ;;  %s1404_s1 = inlined_call_operand.vmem [shape: bf16[32,128], index: 1, kind: input, shape index: {}]   ;;  %s1405_s2 = inlined_call_operand.vmem [shape: f32[1,128], index: 2, kind: input, shape index: {}]   ;;  %s1406_s3 = inlined_call_operand.hbm [shape: bf16[128,128], index: 3, kind: input, shape index: {}]   ;;  %s1407_s4 = inlined_call_operand.vmem [shape: f32[1,128], index: 4, kind: input, shape index: {}]   ;;  %s1408_s5 = inlined_call_operand.vmem [shape: bf16[64,64], index: 5, kind: input, shape index: {}]   ;;  %s1409_s6 = inlined_call_operand.hbm [shape: f32[64,128], index: 6, kind: output, shape index: {}]  }
   0x1   :  { %12 = vsyncpa [#allocation7], 0  ;;  %s1209_s21 = smov 0  }
   0x2 LB: > { %s1215_s22 = sadd.s32 4294967295, %s1164_s21   ;;  %p874_p0 = scmp.ge.s32.totalorder %s1164_s21, 1  ;;  %s1164_s21 = sphi %s1209_s21, %s18_s21  }
   0x3   : > { %p175_p1 = scmp.lt.s32.totalorder %s1164_s21, 5  ;;  %s1166_s23 = smov [#allocation5]  }
   0x4   : > { %s196_s24 = sshll.u32 %s1166_s23, 4  ;;  %p1410_p4 = scmp.eq.s32.totalorder %s1215_s22, 0  ;;  %s197_s24 = int_to_ptr.vmem [resolvable:$true] %s196_s24 }
   0x5   : > { %p1220_p3 = pnand %p874_p0, %p175_p1  ;;  %s1096_s29 = scalar_lea.hbm %s1406_s3, 1024 }
   0x6   : > { %p1097_p7 = scmp.ne.s32.totalorder %s1406_s3, %s1096_s29  ;;  %p1103_p11 = scmp.lt.u32.totalorder %s1096_s29, %s1406_s3 }
   0x7   : > { %s1412_s25 = scalar_select %p1220_p3, 1, 0 }
   0x8   : > { %p1024_p5 = pneg %p1220_p3 }
   0xa   : > { %p1229_p6 = pnand %p1410_p4, %p1024_p5 }
   0xc   : > { %p1098_p8 = pneg %p1229_p6 }
   0xe   : > { %p1099_p9 = pnand %p1098_p8, %p1097_p7 }
  0x10   : > { %p1100_p10 = pneg %p1099_p9 }
  0x12   : > { %p1105_p12 = pnand %p1103_p11, %p1100_p10 }
  0x14   : > { %1108 = shalt.err (!%p1105_p12)
}
  0x15   : > { %s1109_s10 = scalar_lea.vmem %s197_s24, 1024  ;;  %p1117_p5 = scmp.lt.s32.totalorder %s197_s24, %s197_s24 }
  0x16   : > { %p1110_p13 = scmp.ne.s32.totalorder %s197_s24, %s1109_s10  ;;  %p1118_p2 = scmp.lt.s32.totalorder %s1109_s10, %s1109_s10 }
  0x18   : > { %p1112_p0 = pnand %p1110_p13, %p1098_p8  ;;  %p1119_p4 = por %p1118_p2, %p1117_p5 }
  0x1a   : > { %p1113_p1 = pneg %p1112_p0 }
  0x1c   : > { %p1120_p3 = pnand %p1119_p4, %p1113_p1 }
  0x1e   : > { %1123 = shalt.err (!%p1120_p3)
}
  0x1f   : > { %s1167_s11 = smov 64   ;;  %s1168_s12 = smov 4  }
  0x20   : > { %1027 = dma.hbm_to_vmem [thread:$0]  (!%p1229_p6), %s1406_s3, 1024, %s197_s24, [#allocation6], %s1167_s11, %s1167_s11, %s1168_s12  }
  0x21   : > { %p1414_p7 = scmp.ne.s32.totalorder %s1412_s25, 0 }
  0x22   : > { %p1415_p9 = scmp.eq.s32.totalorder (!%p1414_p7), %s1215_s22, 0 }
  0x23   : > { %224 = sbr.rel (%p1414_p7) target bundleno = 1329 (0x531), region = 44 }
  0x2a   : > { %1155 = dma.done.wait (%p1415_p9), [#allocation6], 1024   ;;  %p1416_p8 = pmov %p1415_p9 }
  0x2b   : > { %s879_s15 = sshll.u32 %s1215_s22, 1  ;;  %p1417_p3 = scmp.ne.s32.totalorder %s1215_s22, 0 }
  0x2c   : > { %1157 = vsyncadd (%p1416_p8), [#allocation6], 4294966272  ;;  %p250_p2 = scmp.lt.s32.totalorder %s879_s15, 7  ;;  %v1048_v0 = vld [vmem:[%s1404_s1] sm:$0xff] (!%p1417_p3)   ;;  %v1049_v1 = vld [vmem:[%s1404_s1 + $0x8] sm:$0xff] (!%p1417_p3)   ;;  %vm304_vm0 = vcmask (!%p1417_p3), 261120  }
  0x2d   : > { %259 = sbr.rel (%p1417_p3) target bundleno = 271 (0x10f), region = 52  ;;  %948 = vmatprep.subr.bf16.mxu0 (!%p1417_p3), %v1048_v0  ;;  %1012 = vmatprep.subr.bf16.mxu1 (!%p1417_p3), %v1048_v0  ;;  %v1050_v2 = vld [vmem:[%s1403_s0] sm:$0xff] (!%p1417_p3)   ;;  %v1051_v3 = vld [vmem:[%s1403_s0 + $0x10] sm:$0xff] (!%p1417_p3)   ;;  %v1052_v4 = vld [vmem:[%s1403_s0 + $0x8] sm:$0xff] (!%p1417_p3)  }
  0x2e   : > { %s1419_s15 = smov (!%p250_p2, %s879_s15), 7  ;;  %949 = vmatpush3.bf16.msra.mxu0 (!%p1417_p3), %v1048_v0  ;;  %1014 = vmatpush3.bf16.msra.mxu1 (!%p1417_p3), %v1048_v0  ;;  %v1053_v5 = vld [vmem:[%s1403_s0 + $0x18] sm:$0xff] (!%p1417_p3)  }
  0x2f   : > { %s880_s16 = sshll.u32 %s1419_s15, 2  ;;  %950 = vmatprep.subr.bf16.mxu0 (!%p1417_p3), %v1049_v1  ;;  %1013 = vmatprep.subr.bf16.mxu1 (!%p1417_p3), %v1049_v1 }
  0x30   : > { %s1259_s19 = scalar_lea.vmem %s1408_s5, %s880_s16  ;;  %952 = vmatprep.mubr.msk.bf16.mxu0 (!%p1417_p3), %vm304_vm0, %v1050_v2  ;;  %956 = vmatprep.mubr.msk.bf16.mxu1 (!%p1417_p3), %vm304_vm0, %v1051_v3 }
  0x32   : > { %951 = vmatpush3.bf16.msra.mxu0 (!%p1417_p3), %v1049_v1  ;;  %1015 = vmatpush3.bf16.msra.mxu1 (!%p1417_p3), %v1049_v1 }
  0x35   : > { %953 = vmatmul.mubr.msk.bf16.vlgmr.msra.gmra.mrb[0].mxu0 %vm304_vm0, %v1052_v4  ;;  %957 = vmatmul.mubr.msk.bf16.vlgmr.msra.gmra.mrb[0].mxu1 %vm304_vm0, %v1053_v5 }
 0x108   : > { %v954_v6 = vpop.f32.mrb[0].mxu0  ;;  %v958_v7 = vpop.f32.mrb[0].mxu1 }
 0x109   : > { %v351_v8 = vpop.f32.mrb[1].mxu0  ;;  %v367_v9 = vpop.f32.mrb[1].mxu1 }
 0x10a   : > { %v955_v10 = vpop.f32.mrb[2].mxu0  ;;  %v959_v11 = vpop.f32.mrb[2].mxu1 }
 0x10b   : > { %v383_v12 = vpack.c.bf16 %v955_v10, %v954_v6  ;;  %v385_v13 = vpack.c.bf16 %v959_v11, %v958_v7  ;;  %v354_v14 = vpop.f32.mrb[3].mxu0  ;;  %v370_v15 = vpop.f32.mrb[3].mxu1 }
 0x10c   : > { %v382_v16 = vpack.c.bf16 %v354_v14, %v351_v8  ;;  %v384_v17 = vpack.c.bf16 %v370_v15, %v367_v9 }
 0x10d   : > { %387 = vst [vmem:[#allocation2 + $0x8] sm:$0xff] %v383_v12  ;;  %389 = vst [vmem:[#allocation2 + $0x18] sm:$0xff] %v385_v13 }
 0x10e   : > { %386 = vst [vmem:[#allocation2] sm:$0xff] %v382_v16  ;;  %388 = vst [vmem:[#allocation2 + $0x10] sm:$0xff] %v384_v17 }
 0x10f PF: > { %s892_s10 = sshll.u32 %s1215_s22, 4  ;;  %v1169_v19 = vmov 0.0   ;;  %vm1170_vm1 = vmmov 0   ;;  %v1054_v20 = vld [vmem:[%s1259_s19] sm:$0xff]   ;;  %vm403_vm2 = vcmask 523264   ;;  %p899_p4 = scmp.ne.s32.totalorder %s1215_s22, 3 }
 0x110   : > { %960 = vmatprep.subr.bf16.mxu0 %v1169_v19  ;;  %968 = vmatprep.mubr.msk.bf16.mxu0 %vm1170_vm1, %v1169_v19  ;;  %s399_s11 = sshra.s32 %s892_s10, 4  ;;  %v1055_v24 = vld [vmem:[%s1259_s19] sm:$0xff]   ;;  %v1057_v36 = vld [vmem:[#allocation5 + $0x8] sm:$0xff] (!%p899_p4)   ;;  %v1058_v37 = vld [vmem:[#allocation5 + $0x10] sm:$0xff] (!%p899_p4)   ;;  %v702_v63 = vlaneseq (!%p899_p4) }
 0x111   : > { %s894_s12 = sshll.u32 %s399_s11, 3  ;;  %v895_v25 = vld [vmem:[%s1405_s2] ss:$0 sm:$0xff]  ;;  %v1059_v38 = vld [vmem:[#allocation5 + $0x18] sm:$0xff] (!%p899_p4)   ;;  %v1061_v41 = vld [vmem:[#allocation5 + $0x28] sm:$0xff] (!%p899_p4)  }
 0x112   : > { %s402_s13 = scalar_lea.vmem [#allocation3], %s894_s12  ;;  %s471_s16 = scalar_lea.vmem [#allocation4], %s894_s12  ;;  %v1056_v35 = vld [vmem:[#allocation5] sm:$0xff] (!%p899_p4)   ;;  %v1062_v42 = vld [vmem:[#allocation5 + $0x30] sm:$0xff] (!%p899_p4)   ;;  %v1063_v43 = vld [vmem:[#allocation5 + $0x38] sm:$0xff] (!%p899_p4)   ;;  %v703_v0 = vand.u32 (!%p899_p4), 127, %v702_v63 }
 0x113   : > { %404 = vst.msk [vmem:[%s402_s13] sm:$0xff] %vm403_vm2, %v1054_v20  ;;  %v1060_v40 = vld [vmem:[#allocation5 + $0x20] sm:$0xff] (!%p899_p4)  }
 0x114   : > { %v408_v21 = vld [vmem:[#allocation2 + $0x8] sm:$0xff]  ;;  %v410_v23 = vld [vmem:[#allocation2 + $0x18] sm:$0xff]  ;;  %v908_v1 = vld [vmem:[%s1407_s4] ss:$0 sm:$0xff] (!%p899_p4)  ;;  %vm704_vm3 = vcmp.lt.s32.totalorder (!%p899_p4), %v703_v0, 8 }
 0x115   : > { %v407_v18 = vld [vmem:[#allocation2] sm:$0xff]  ;;  %v409_v22 = vld [vmem:[#allocation2 + $0x10] sm:$0xff] }
 0x116   : > { %961 = vmatpush3.bf16.msra.mxu0 %v407_v18 }
 0x117   : > { %962 = vmatprep.subr.bf16.mxu0 %v1169_v19 }
 0x11a   : > { %963 = vmatpush3.bf16.msra.mxu0 %v408_v21  ;;  %v610_v47 = vld [vmem:[#allocation3] sm:$0xff] (!%p899_p4)  ;;  %v611_v60 = vld [vmem:[#allocation3 + $0x8] sm:$0xff] (!%p899_p4)  ;;  %v612_v61 = vld [vmem:[#allocation3 + $0x10] sm:$0xff] (!%p899_p4) }
 0x11b   : > { %964 = vmatprep.subr.bf16.mxu0 %v1169_v19  ;;  %1004 = vmatprep.mubr.msk.bf16.mxu1 (!%p899_p4), %vm403_vm2, %v610_v47  ;;  %v613_v62 = vld [vmem:[#allocation3 + $0x18] sm:$0xff] (!%p899_p4) }
 0x11e   : > { %965 = vmatpush3.bf16.msra.mxu0 %v409_v22 }
 0x11f   : > { %966 = vmatprep.subr.bf16.mxu0 %v1169_v19 }
 0x122   : > { %967 = vmatpush3.bf16.msra.mxu0 %v410_v23 }
 0x123   : > { %972 = vmatprep.subr.bf16.mxu0 (!%p899_p4), %v1056_v35 }
 0x125   : > { %969 = vmatmul.mubr.msk.bf16.vlgmr.msra.gmra.mrb[0].mxu0 %vm403_vm2, %v1055_v24 }
 0x126   : > { %973 = vmatpush3.bf16.msra.mxu0 (!%p899_p4), %v1056_v35 }
 0x127   : > { %974 = vmatprep.subr.bf16.mxu0 (!%p899_p4), %v1057_v36 }
 0x12a   : > { %975 = vmatpush3.bf16.msra.mxu0 (!%p899_p4), %v1057_v36 }
 0x12b   : > { %976 = vmatprep.subr.bf16.mxu0 (!%p899_p4), %v1058_v37 }
 0x12e   : > { %977 = vmatpush3.bf16.msra.mxu0 (!%p899_p4), %v1058_v37 }
 0x12f   : > { %978 = vmatprep.subr.bf16.mxu0 (!%p899_p4), %v1059_v38 }
 0x132   : > { %979 = vmatpush3.bf16.msra.mxu0 (!%p899_p4), %v1059_v38 }
 0x133   : > { %980 = vmatprep.subr.bf16.mxu0 (!%p899_p4), %v1060_v40 }
 0x136   : > { %981 = vmatpush3.bf16.msra.mxu0 (!%p899_p4), %v1060_v40 }
 0x137   : > { %982 = vmatprep.subr.bf16.mxu0 (!%p899_p4), %v1061_v41 }
 0x13a   : > { %983 = vmatpush3.bf16.msra.mxu0 (!%p899_p4), %v1061_v41 }
 0x13b   : > { %984 = vmatprep.subr.bf16.mxu0 (!%p899_p4), %v1062_v42 }
 0x13e   : > { %985 = vmatpush3.bf16.msra.mxu0 (!%p899_p4), %v1062_v42 }
 0x13f   : > { %986 = vmatprep.subr.bf16.mxu0 (!%p899_p4), %v1063_v43 }
 0x142   : > { %987 = vmatpush3.bf16.msra.mxu0 (!%p899_p4), %v1063_v43 }
 0x1f8   : > { %v460_v26 = vpop.f32.mrb[0].mxu0 }
 0x1f9   : > { %v461_v27 = vadd.f32 %v895_v25, %v460_v26  ;;  %v970_v28 = vpop.f32.mrb[1].mxu0 }
 0x1fa   : > { %v463_v29 = vpop.f32.mrb[2].mxu0 }
 0x1fb   : > { %v464_v30 = vadd.f32 %v895_v25, %v463_v29  ;;  %v971_v31 = vpop.f32.mrb[3].mxu0  ;;  %v467_v32 = vmax.f32 %v461_v27, 0.0  ;;  %476 = sbr.rel (%p899_p4) target bundleno = 1303 (0x517), region = 56 }
 0x1fd   : > { %v468_v33 = vmax.f32 %v464_v30, 0.0 }
 0x1ff   : > { %v469_v34 = vpack.c.bf16 %v468_v33, %v467_v32 }
 0x201   : > { %472 = vst [vmem:[%s471_s16] sm:$0xff] %v469_v34 }
 0x208   : > { %v477_v39 = vld [vmem:[#allocation4] sm:$0xff]  ;;  %v478_v44 = vld [vmem:[#allocation4 + $0x8] sm:$0xff]  ;;  %v479_v45 = vld [vmem:[#allocation4 + $0x10] sm:$0xff] }
 0x209   : > { %988 = vmatprep.mubr.bf16.mxu0 %v477_v39  ;;  %v480_v46 = vld [vmem:[#allocation4 + $0x18] sm:$0xff] }
 0x20a   : > { %989 = vmatmul.mubr.bf16.vlgmr.msra.gmra.mrb[0].mxu0 %v478_v44 }
 0x20b   : > { %992 = vmatprep.mubr.bf16.mxu0 %v479_v45 }
 0x212   : > { %993 = vmatmul.mubr.bf16.gmra.mrb[4].mxu0 %v480_v46 }
 0x2dd   : > { %v990_v48 = vpop.f32.mrb[0].mxu0 }
 0x2de   : > { %v579_v49 = vpop.f32.mrb[1].mxu0 }
 0x2df   : > { %v991_v50 = vpop.f32.mrb[2].mxu0 }
 0x2e0   : > { %v615_v51 = vpack.c.bf16 %v991_v50, %v990_v48  ;;  %v582_v52 = vpop.f32.mrb[3].mxu0 }
 0x2e1   : > { %v614_v53 = vpack.c.bf16 %v582_v52, %v579_v49 }
 0x2e3   : > { %996 = vmatprep.subr.bf16.mxu1 %v614_v53 }
 0x2e4   : > { %997 = vmatpush3.bf16.msra.mxu1 %v614_v53 }
 0x2e5   : > { %v994_v54 = vpop.f32.mrb[4].mxu0  ;;  %998 = vmatprep.subr.bf16.mxu1 %v615_v51 }
 0x2e6   : > { %v595_v55 = vpop.f32.mrb[5].mxu0 }
 0x2e7   : > { %v995_v56 = vpop.f32.mrb[6].mxu0 }
 0x2e8   : > { %v617_v57 = vpack.c.bf16 %v995_v56, %v994_v54  ;;  %v598_v58 = vpop.f32.mrb[7].mxu0  ;;  %999 = vmatpush3.bf16.msra.mxu1 %v615_v51 }
 0x2e9   : > { %v616_v59 = vpack.c.bf16 %v598_v58, %v595_v55 }
 0x2eb   : > { %1000 = vmatprep.subr.bf16.mxu1 %v616_v59 }
 0x2ec   : > { %1001 = vmatpush3.bf16.msra.mxu1 %v616_v59 }
 0x2ed   : > { %1002 = vmatprep.subr.bf16.mxu1 %v617_v57 }
 0x2f0   : > { %1003 = vmatpush3.bf16.msra.mxu1 %v617_v57 }
 0x2f3   : > { %1005 = vmatmul.mubr.msk.bf16.vlgmr.msra.gmra.mrb[0].mxu1 %vm403_vm2, %v611_v60 }
 0x2f4   : > { %1008 = vmatprep.mubr.msk.bf16.mxu1 %vm403_vm2, %v612_v61 }
 0x2fb   : > { %1009 = vmatmul.mubr.msk.bf16.gmra.mrb[4].mxu1 %vm403_vm2, %v613_v62 }
 0x3c6   : > { %v1006_v2 = vpop.f32.mrb[0].mxu1 }
 0x3c7   : > { %v680_v3 = vadd.f32 %v1006_v2, %v908_v1  ;;  %v671_v4 = vpop.f32.mrb[1].mxu1 }
 0x3c8   : > { %v672_v5 = vadd.f32 %v908_v1, %v671_v4  ;;  %v1007_v6 = vpop.f32.mrb[2].mxu1 }
 0x3c9   : > { %v683_v7 = vadd.f32 %v1007_v6, %v908_v1  ;;  %v674_v8 = vpop.f32.mrb[3].mxu1  ;;  %v1298_v9 = vsel %vm704_vm3, %v680_v3, -1e+30 }
 0x3ca   : > { %v675_v10 = vadd.f32 %v908_v1, %v674_v8  ;;  %717 = vmax.xlane.f32.xlu1 %v1298_v9  ;;  %v1302_v11 = vsel %vm704_vm3, %v672_v5, -1e+30 }
 0x3cb   : > { %713 = vmax.xlane.f32.xlu0 %v1302_v11  ;;  %v1306_v12 = vsel %vm704_vm3, %v683_v7, -1e+30 }
 0x3cc   : > { %v1310_v14 = vsel %vm704_vm3, %v675_v10, -1e+30 }
 0x3ce   : > { %719 = vmax.xlane.f32.xlu1 %v1306_v12  ;;  %v1010_v13 = vpop.f32.mrb[4].mxu1 }
 0x3cf   : > { %v687_v15 = vpop.f32.mrb[5].mxu1  ;;  %715 = vmax.xlane.f32.xlu0 %v1310_v14  ;;  %v696_v19 = vadd.f32 %v1010_v13, %v908_v1 }
 0x3d0   : > { %v688_v16 = vadd.f32 %v908_v1, %v687_v15  ;;  %v1011_v17 = vpop.f32.mrb[6].mxu1 }
 0x3d1   : > { %v690_v18 = vpop.f32.mrb[7].mxu1  ;;  %v699_v22 = vadd.f32 %v1011_v17, %v908_v1  ;;  %v1322_v24 = vsel %vm704_vm3, %v696_v19, -1e+30 }
 0x3d2   : > { %v691_v20 = vadd.f32 %v908_v1, %v690_v18  ;;  %v1314_v21 = vsel %vm704_vm3, %v688_v16, -1e+30 }
 0x3d3   : > { %721 = vmax.xlane.f32.xlu0 %v1314_v21  ;;  %v1326_v25 = vsel %vm704_vm3, %v699_v22, -1e+30 }
 0x3d4   : > { %v1318_v23 = vsel %vm704_vm3, %v691_v20, -1e+30 }
 0x3d5   : > { %723 = vmax.xlane.f32.xlu1 %v1318_v23 }
 0x3d7   : > { %725 = vmax.xlane.f32.xlu0 %v1322_v24 }
 0x3d9   : > { %727 = vmax.xlane.f32.xlu1 %v1326_v25 }
 0x457   : > { %v1329_v26 = vpop.xlane.xlu1 %717 }
 0x458   : > { %v731_v27 = vsub.f32 %v1298_v9, %v1329_v26  ;;  %v1333_v28 = vpop.xlane.xlu0 %713 }
 0x459   : > { %v729_v29 = vsub.f32 %v1302_v11, %v1333_v28 }
 0x45a   : > { %v741_v30 = vmul.f32 1.442695, %v731_v27 }
 0x45b   : > { %v737_v31 = vmul.f32 1.442695, %v729_v29  ;;  %v1337_v32 = vpop.xlane.xlu1 %719 }
 0x45c   : > { %1064 = vpow2.f32 %v741_v30  ;;  %v732_v33 = vsub.f32 %v1306_v12, %v1337_v32  ;;  %v1341_v34 = vpop.xlane.xlu0 %715 }
 0x45d   : > { %v730_v35 = vsub.f32 %v1310_v14, %v1341_v34  ;;  %1066 = vpow2.f32 %v737_v31 }
 0x45e   : > { %v743_v36 = vmul.f32 1.442695, %v732_v33 }
 0x45f   : > { %v739_v37 = vmul.f32 1.442695, %v730_v35 }
 0x460   : > { %1068 = vpow2.f32 %v743_v36  ;;  %v1345_v38 = vpop.xlane.xlu0 %721 }
 0x461   : > { %v733_v39 = vsub.f32 %v1314_v21, %v1345_v38  ;;  %1070 = vpow2.f32 %v739_v37 }
 0x462   : > { %v1349_v40 = vpop.xlane.xlu1 %723 }
 0x463   : > { %v745_v41 = vmul.f32 1.442695, %v733_v39  ;;  %v734_v42 = vsub.f32 %v1318_v23, %v1349_v40 }
 0x464   : > { %v1353_v43 = vpop.xlane.xlu0 %725 }
 0x465   : > { %1072 = vpow2.f32 %v745_v41  ;;  %v747_v44 = vmul.f32 1.442695, %v734_v42  ;;  %v735_v45 = vsub.f32 %v1322_v24, %v1353_v43 }
 0x466   : > { %v1065_v46 = vpop.eup %1064  ;;  %v1357_v47 = vpop.xlane.xlu1 %727 }
 0x467   : > { %1074 = vpow2.f32 %v747_v44  ;;  %v749_v48 = vmul.f32 1.442695, %v735_v45  ;;  %v736_v49 = vsub.f32 %v1326_v25, %v1357_v47  ;;  %757 = vadd.xlane.f32.xlu0 %v1065_v46  ;;  %v1067_v50 = vpop.eup %1066 }
 0x469   : > { %1076 = vpow2.f32 %v749_v48  ;;  %v751_v51 = vmul.f32 1.442695, %v736_v49 }
 0x46a   : > { %v1069_v52 = vpop.eup %1068 }
 0x46b   : > { %1078 = vpow2.f32 %v751_v51  ;;  %759 = vadd.xlane.f32.xlu1 %v1069_v52  ;;  %753 = vadd.xlane.f32.xlu0 %v1067_v50  ;;  %v1071_v53 = vpop.eup %1070 }
 0x46f   : > { %v1073_v54 = vpop.eup %1072  ;;  %755 = vadd.xlane.f32.xlu1 %v1071_v53 }
 0x470   : > { %761 = vadd.xlane.f32.xlu0 %v1073_v54 }
 0x471   : > { %v1075_v55 = vpop.eup %1074 }
 0x473   : > { %v1077_v56 = vpop.eup %1076  ;;  %763 = vadd.xlane.f32.xlu1 %v1075_v55 }
 0x474   : > { %765 = vadd.xlane.f32.xlu0 %v1077_v56 }
 0x475   : > { %v1079_v57 = vpop.eup %1078 }
 0x477   : > { %767 = vadd.xlane.f32.xlu1 %v1079_v57 }
 0x4f4   : > { %v758_v58 = vpop.xlane.xlu0 %757 }
 0x4f5   : > { %1080 = vlog2.f32 %v758_v58 }
 0x4f8   : > { %v760_v59 = vpop.xlane.xlu1 %759  ;;  %v754_v60 = vpop.xlane.xlu0 %753 }
 0x4f9   : > { %1082 = vlog2.f32 %v760_v59 }
 0x4fa   : > { %1084 = vlog2.f32 %v754_v60 }
 0x4fc   : > { %v756_v61 = vpop.xlane.xlu1 %755 }
 0x4fd   : > { %1086 = vlog2.f32 %v756_v61  ;;  %v762_v62 = vpop.xlane.xlu0 %761 }
 0x4fe   : > { %1088 = vlog2.f32 %v762_v62 }
 0x4ff   : > { %v1081_v63 = vpop.eup %1080 }
 0x500   : > { %v774_v0 = vmul.f32 0.6931472, %v1081_v63  ;;  %v764_v1 = vpop.xlane.xlu1 %763 }
 0x501   : > { %1090 = vlog2.f32 %v764_v1  ;;  %v766_v2 = vpop.xlane.xlu0 %765 }
 0x502   : > { %v787_v3 = vadd.f32 %v774_v0, %v1329_v26  ;;  %1092 = vlog2.f32 %v766_v2 }
 0x503   : > { %v1083_v4 = vpop.eup %1082 }
 0x504   : > { %v1085_v5 = vpop.eup %1084  ;;  %v795_v6 = vsub.f32 %v1298_v9, %v787_v3  ;;  %v776_v7 = vmul.f32 0.6931472, %v1083_v4  ;;  %v768_v8 = vpop.xlane.xlu1 %767 }
 0x505   : > { %v770_v10 = vmul.f32 0.6931472, %v1085_v5  ;;  %1094 = vlog2.f32 %v768_v8 }
 0x506   : > { %803 = vst [vmem:[#allocation8 + $0x10] sm:$0xff] %v795_v6  ;;  %v788_v13 = vadd.f32 %v776_v7, %v1337_v32 }
 0x507   : > { %v1087_v15 = vpop.eup %1086  ;;  %v785_v16 = vadd.f32 %v770_v10, %v1333_v28 }
 0x508   : > { %v1089_v17 = vpop.eup %1088  ;;  %v796_v18 = vsub.f32 %v1306_v12, %v788_v13  ;;  %v772_v19 = vmul.f32 0.6931472, %v1087_v15 }
 0x509   : > { %v793_v20 = vsub.f32 %v1302_v11, %v785_v16  ;;  %v778_v22 = vmul.f32 0.6931472, %v1089_v17 }
 0x50a   : > { %804 = vst [vmem:[#allocation8 + $0x18] sm:$0xff] %v796_v18  ;;  %v786_v9 = vadd.f32 %v772_v19, %v1341_v34 }
 0x50b   : > { %v1091_v26 = vpop.eup %1090  ;;  %801 = vst [vmem:[#allocation8] sm:$0xff] %v793_v20  ;;  %v789_v27 = vadd.f32 %v778_v22, %v1345_v38 }
 0x50c   : > { %v1093_v29 = vpop.eup %1092  ;;  %v794_v30 = vsub.f32 %v1310_v14, %v786_v9  ;;  %v780_v31 = vmul.f32 0.6931472, %v1091_v26 }
 0x50d   : > { %v797_v28 = vsub.f32 %v1314_v21, %v789_v27  ;;  %v782_v32 = vmul.f32 0.6931472, %v1093_v29 }
 0x50e   : > { %802 = vst [vmem:[#allocation8 + $0x8] sm:$0xff] %v794_v30  ;;  %v790_v12 = vadd.f32 %v780_v31, %v1349_v40 }
 0x50f   : > { %v1095_v33 = vpop.eup %1094  ;;  %805 = vst [vmem:[#allocation8 + $0x20] sm:$0xff] %v797_v28  ;;  %v791_v11 = vadd.f32 %v782_v32, %v1353_v43 }
 0x510   : > { %v798_v34 = vsub.f32 %v1318_v23, %v790_v12  ;;  %v784_v35 = vmul.f32 0.6931472, %v1095_v33 }
 0x511   : > { %v799_v36 = vsub.f32 %v1322_v24, %v791_v11 }
 0x512   : > { %806 = vst [vmem:[#allocation8 + $0x28] sm:$0xff] %v798_v34  ;;  %v792_v37 = vadd.f32 %v784_v35, %v1357_v47 }
 0x513   : > { %807 = vst [vmem:[#allocation8 + $0x30] sm:$0xff] %v799_v36 }
 0x514   : > { %v800_v14 = vsub.f32 %v1326_v25, %v792_v37 }
 0x516   : > { %808 = vst [vmem:[#allocation8 + $0x38] sm:$0xff] %v800_v14 }
 0x517 PF: > { %p1030_p6 = scmp.eq.s32.totalorder %s1215_s22, 3  ;;  %s1171_s19 = smov [#allocation8]  }
 0x518   : > { %s815_s20 = sshll.u32 %s1171_s19, 4  ;;  %s816_s20 = int_to_ptr.vmem [resolvable:$true] %s815_s20 }
 0x519   : > { %s1124_s23 = scalar_lea.vmem %s816_s20, 1024  ;;  %p1131_p13 = scmp.lt.s32.totalorder %s816_s20, %s816_s20 }
 0x51a   : > { %p1125_p10 = scmp.ne.s32.totalorder %s816_s20, %s1124_s23  ;;  %p1132_p0 = scmp.lt.s32.totalorder %s1124_s23, %s1124_s23 }
 0x51c   : > { %p1126_p11 = pnand %p1125_p10, %p1030_p6  ;;  %p1133_p1 = por %p1132_p0, %p1131_p13 }
 0x51e   : > { %p1127_p12 = pneg %p1126_p11 }
 0x520   : > { %p1134_p5 = pnand %p1133_p1, %p1127_p12 }
 0x522   : > { %1137 = shalt.err (!%p1134_p5)
}
 0x523   : > { %s1138_s26 = scalar_lea.hbm %s1409_s6, 1024 }
 0x524   : > { %p1139_p7 = scmp.ne.s32.totalorder %s1409_s6, %s1138_s26  ;;  %p1144_p2 = scmp.lt.u32.totalorder %s1138_s26, %s1409_s6 }
 0x526   : > { %p1140_p9 = pnand %p1139_p7, %p1030_p6 }
 0x528   : > { %p1141_p8 = pneg %p1140_p9 }
 0x52a   : > { %p1146_p3 = pnand %p1144_p2, %p1141_p8 }
 0x52c   : > { %1149 = shalt.err (!%p1146_p3)
}
 0x52d   : > { %s1172_s7 = smov 128   ;;  %s1173_s8 = smov 8  }
 0x52e   : > { %1021 = dma.vmem_to_hbm [thread:$0]  (%p1030_p6), %s816_s20, 1024, %s1409_s6, [#allocation7], %s1172_s7, %s1172_s7, %s1173_s8  }
 0x52f   : > { %1159 = dma.done.wait (%p1030_p6), [#allocation7], 1024  }
 0x530   : > { %1161 = vsyncadd (%p1030_p6), [#allocation7], 4294966272 }
 0x531 PF: > { %s18_s21 = sadd.s32 1, %s1164_s21  }
 0x532   : > { %p15_p4 = scmp.ge.s32.totalorder %s18_s21, 6  }
 0x534   :  { %17 = sbr.rel (!%p15_p4) target bundleno = 2 (0x2), region = 86 }
 0x53b   :  { %831 = vsyncpa [#allocation6], 1 }
 0x53c   :  { %833 = vsyncpa [#allocation6 + $0x1], 1 }
 0x53d   :  { %834 = vsyncpa [#allocation7], 1 }
 0x53e   :  { %836 = vsyncpa [#allocation7 + $0x1], 1 }

</bundles_post_ra>
